<compile_context>
chip_gen: v5e
topology: v5e:2x2
jax: 0.10.0
libtpu: 0.0.40
codegen_flags: <defaults>
</compile_context>

<pallas_src>
import sys

import jax
import jax.numpy as jnp
from jax.experimental import pallas as pl
from jax.experimental.pallas import tpu as pltpu


LANE = 128            # minimum lane alignment for feature dims
WIDE_LANE = 256       # v6e/v7x MXUs are 256-wide
WIDE_LANE_MIN = 192   # dims >= this get 256-aligned
DEFAULT_TM = 512      # row tile; amortizes ~0.35us/grid-step overhead, shrunk to fit VMEM


def _round_up(x: int, m: int) -> int:
    return (x + m - 1) // m * m


def _cdiv(a: int, b: int) -> int:
    return (a + b - 1) // b


def _pad_feature(d: int) -> int:
    """Lane-pad a feature dim (256-align for the 256-wide MXUs once big enough)."""
    return _round_up(d, WIDE_LANE if d >= WIDE_LANE_MIN else LANE)


def _pad2d(a, rows: int, cols: int):
    pr, pc = rows - a.shape[0], cols - a.shape[1]
    if pr or pc:
        a = jnp.pad(a, ((0, pr), (0, pc)))
    return a


def _sublane_pack(dtype) -> int:
    """Row granularity so packed dtypes fill whole sublane groups (8 x 32-bit base)."""
    return max(8, 8 * (4 // jnp.dtype(dtype).itemsize))


def _vmem_capacity_bytes() -> int:
    try:
        return int(pltpu.get_tpu_info().vmem_capacity_bytes)
    except Exception:
        return 64 << 20  # conservative fallback: v7x per-TensorCore VMEM


def _single_buffer_supported() -> bool:
    """Feature-detect BlockSpec(pipeline_mode=pl.Buffered(1)) without executing."""
    try:
        pl.BlockSpec((8, LANE), lambda i: (0, 0), pipeline_mode=pl.Buffered(1))
        return True
    except Exception:
        return False


def make_mlp_kernel(num_layers: int, softmax_output: bool, valid_out: int,
                    padded_out: int, compute_dtype, approx_recip: bool):
    """Kernel body: matmuls in compute_dtype (bf16 -> native MXU), f32 accumulation.

    Softmax epilogue runs in f32, masks the zero-padded output lanes, and uses the
    EUP reciprocal (exp / reciprocal / row-reduce sit on EUP/XLU slots, free under
    MXU slack, so no further micro-optimization is needed there).
    """
    f32_matmul = jnp.dtype(compute_dtype) == jnp.dtype(jnp.float32)
    precision = jax.lax.Precision.HIGHEST if f32_matmul else None

    def kernel(x_ref, *refs):
        out_ref = refs[-1]
        wb = refs[:-1]                      # w0, b0, w1, b1, ...
        h = x_ref[...]                      # storage/compute dtype operand for the MXU
        for i in range(num_layers):
            w = wb[2 * i][...]
            b = wb[2 * i + 1][...]          # (1, out_p) f32
            acc = jnp.dot(h, w, preferred_element_type=jnp.float32,
                          precision=precision) + b
            if i < num_layers - 1:
                h = jnp.maximum(acc, 0.0).astype(compute_dtype)
            else:
                h = acc                     # keep f32 for the epilogue
        if softmax_output:
            if valid_out != padded_out:
                col = jax.lax.broadcasted_iota(jnp.int32, h.shape, 1)
                h = jnp.where(col < valid_out, h, -1e30)
            m = jnp.max(h, axis=-1, keepdims=True)
            e = jnp.exp(h - m)
            s = jnp.sum(e, axis=-1, keepdims=True)
            h = e * pl.reciprocal(s, approx=approx_recip)
        out_ref[...] = h.astype(out_ref.dtype)

    return kernel


def mlp_forward(x, params, *, softmax_output: bool = False,
                compute_dtype=jnp.bfloat16, tm: int = DEFAULT_TM,
                approx_softmax_recip: bool = True):
    """Run the fused MLP Pallas kernel.

    x: (..., input_dim). params: list of (W, b) with W (in, out), b (1, out) or (out,).
    compute_dtype: MXU operand dtype (bf16 default; pass jnp.float32 for strict accuracy).
    """
    orig_shape = x.shape
    in_dim = orig_shape[-1]
    out_dim = params[-1][0].shape[1]
    num_layers = len(params)
    out_dtype = x.dtype

    x2 = x.reshape(-1, in_dim)
    n = x2.shape[0]

    # ---- padded working shapes (lane/MXU aligned) --------------------------
    dims = [in_dim] + [w.shape[1] for (w, _) in params]
    for li, (w, _) in enumerate(params):
        assert w.shape[0] == dims[li], "layer in_features mismatch"
    dims_p = [_pad_feature(d) for d in dims]

    # ---- row tile -----------------------------------------------------------
    row_pack = max(_sublane_pack(compute_dtype), _sublane_pack(out_dtype))
    tm = max(row_pack, _round_up(tm, row_pack))
    n_pack = _round_up(max(n, 1), row_pack)
    tm_eff = min(tm, n_pack)
    # Guarantee >=2 grid steps when there are enough rows so ("parallel",) can
    # shard the row axis across v7x's two TensorCores.
    if n_pack >= 2 * row_pack:
        tm_eff = min(tm_eff, _round_up(_cdiv(n, 2), row_pack))

    comp_item = jnp.dtype(compute_dtype).itemsize
    out_item = jnp.dtype(out_dtype).itemsize

    single_buffer = _single_buffer_supported()
    weight_bytes = sum(ki * ko * comp_item + ko * 4
                       for ki, ko in zip(dims_p[:-1], dims_p[1:]))

    def vmem_need(rows: int, weight_mult: int) -> int:
        io = 2 * rows * (dims_p[0] * comp_item + dims_p[-1] * out_item)  # dbl-buffered I/O
        act = 2 * rows * max(dims_p) * 4                                 # f32 intermediates
        return weight_mult * weight_bytes + io + act

    vmem_cap = int(0.85 * _vmem_capacity_bytes())
    base_mult = 1 if single_buffer else 2
    while vmem_need(tm_eff, base_mult) * 5 // 4 > vmem_cap and tm_eff > row_pack:
        tm_eff = max(row_pack, _round_up(tm_eff // 2, row_pack))

    def vmem_limit(weight_mult: int) -> int:
        need = vmem_need(tm_eff, weight_mult) * 5 // 4   # +25% for compiler scratch
        return min(max(need, 16 << 20), vmem_cap)

    n_p = _round_up(n, tm_eff)

    # ---- wrapper-side cast + pad (no-ops when already aligned) --------------
    x_p = _pad2d(x2.astype(compute_dtype), n_p, dims_p[0])
    padded_params = []
    for li, (w, b) in enumerate(params):
        w_p = _pad2d(w.astype(compute_dtype), dims_p[li], dims_p[li + 1])
        b_p = _pad2d(jnp.reshape(b, (1, -1)).astype(jnp.float32), 1, dims_p[li + 1])
        padded_params.append((w_p, b_p))

    kernel = make_mlp_kernel(num_layers, softmax_output, out_dim, dims_p[-1],
                             compute_dtype, approx_softmax_recip)

    flops = 2 * n_p * sum(ki * ko for ki, ko in zip(dims_p[:-1], dims_p[1:]))
    transcendentals = n_p * dims_p[-1] if softmax_output else 0
    bytes_accessed = (n_p * dims_p[0] * comp_item + weight_bytes
                      + n_p * dims_p[-1] * out_item)

    def build(use_single_buffer: bool):
        wb_kwargs = ({"pipeline_mode": pl.Buffered(1)} if use_single_buffer else {})
        in_specs = [pl.BlockSpec((tm_eff, dims_p[0]), lambda i: (i, 0))]
        for (w_p, b_p) in padded_params:
            # Weights/biases fully resident in VMEM (constant block index).
            in_specs.append(pl.BlockSpec(w_p.shape, lambda i: (0, 0), **wb_kwargs))
            in_specs.append(pl.BlockSpec(b_p.shape, lambda i: (0, 0), **wb_kwargs))
        return pl.pallas_call(
            kernel,
            out_shape=jax.ShapeDtypeStruct((n_p, dims_p[-1]), out_dtype),
            grid_spec=pltpu.PrefetchScalarGridSpec(
                num_scalar_prefetch=0,
                grid=(n_p // tm_eff,),
                in_specs=in_specs,
                out_specs=pl.BlockSpec((tm_eff, dims_p[-1]), lambda i: (i, 0)),
            ),
            compiler_params=pltpu.CompilerParams(
                dimension_semantics=("parallel",),
                vmem_limit_bytes=vmem_limit(1 if use_single_buffer else 2),
            ),
            cost_estimate=pl.CostEstimate(
                flops=flops,
                transcendentals=transcendentals,
                bytes_accessed=bytes_accessed,
            ),
        )

    flat_args = [x_p]
    for (w_p, b_p) in padded_params:
        flat_args += [w_p, b_p]

    # TODO(synk): when weight_bytes exceeds ~60% of per-core VMEM (large MLPs on
    # v7x's 64 MiB), stream each layer's W in K/N tiles with manual double-buffered
    # pltpu.make_async_copy (weights in memory_space=pl.ANY) instead of full residency.

    if single_buffer:
        try:
            out = build(True)(*flat_args)
        except Exception as e:
            # Surfaced (non-silent) fallback: single-buffer lowering rejected on this
            # jax/Mosaic version.  Note: this eager fallback is wrapper-level only.
            print(f"WARNING: single-buffered weight specs rejected "
                  f"({type(e).__name__}); retrying double-buffered.", file=sys.stderr)
            out = build(False)(*flat_args)
    else:
        out = build(False)(*flat_args)

    if n_p != n or dims_p[-1] != out_dim:
        out = out[:n, :out_dim]
    return out.reshape(orig_shape[:-1] + (out_dim,))


def init_mlp_params(key, input_dim, hidden_dim, output_dim, num_layers,
                    dtype=jnp.float32):
    """Deterministic synthetic init matching nn.Linear shapes (W stored transposed)."""
    dims_in = [input_dim] + [hidden_dim] * (num_layers - 1)
    dims_out = [hidden_dim] * (num_layers - 1) + [output_dim]
    params = []
    for n_in, n_out in zip(dims_in, dims_out):
        key, kw, kb = jax.random.split(key, 3)
        bound = 1.0 / jnp.sqrt(jnp.float32(n_in))
        w = jax.random.uniform(kw, (n_in, n_out), dtype, -bound, bound)
        b = jax.random.uniform(kb, (1, n_out), dtype, -bound, bound)
        params.append((w, b))
    return params


def mlp_reference(x, params, softmax_output):
    h = x
    for i, (w, b) in enumerate(params):
        h = h @ w + jnp.reshape(b, (-1,))
        if i < len(params) - 1:
            h = jax.nn.relu(h)
    if softmax_output:
        h = jax.nn.softmax(h, axis=-1)
    return h


if __name__ == "__main__":
    key = jax.random.PRNGKey(0)
    input_dim, hidden_dim, output_dim, num_layers = 16, 32, 8, 3

    key, kx1, kx2, kp = jax.random.split(key, 4)
    params = init_mlp_params(kp, input_dim, hidden_dim, output_dim, num_layers)

    # Run 1: softmax head, bf16 MXU operands (native-rate path), f32 accumulation.
    x1 = jax.random.normal(kx1, (2, 8, input_dim), jnp.float32)
    out1 = jax.block_until_ready(
        mlp_forward(x1, params, softmax_output=True, compute_dtype=jnp.bfloat16))
    ref1 = mlp_reference(x1, params, True)
    assert out1.shape == (2, 8, output_dim)
    assert jnp.allclose(out1, ref1, atol=2e-2, rtol=2e-2), "bf16 softmax path mismatch"

    # Run 2: plain head, strict f32 compute; 2*7=14 rows -> padded tail + 2 grid steps.
    x2 = jax.random.normal(kx2, (2, 7, input_dim), jnp.float32)
    out2 = jax.block_until_ready(
        mlp_forward(x2, params, softmax_output=False, compute_dtype=jnp.float32,
                    approx_softmax_recip=False))
    ref2 = mlp_reference(x2, params, False)
    assert out2.shape == (2, 7, output_dim)
    assert jnp.allclose(out2, ref2, atol=2e-3, rtol=2e-3), "f32 linear path mismatch"

    print("KERNEL_OK")
</pallas_src>

<mosaic_0001>
module attributes {stable_mosaic.version = 11 : i64} {
  func.func @kernel(%arg0: i32, %arg1: memref<16x128xbf16, #tpu.memory_space<vmem>>, %arg2: memref<128x128xbf16, #tpu.memory_space<vmem>>, %arg3: memref<1x128xf32, #tpu.memory_space<vmem>>, %arg4: memref<128x128xbf16, #tpu.memory_space<vmem>>, %arg5: memref<1x128xf32, #tpu.memory_space<vmem>>, %arg6: memref<128x128xbf16, #tpu.memory_space<vmem>>, %arg7: memref<1x128xf32, #tpu.memory_space<vmem>>, %arg8: memref<16x128xf32, #tpu.memory_space<vmem>>) attributes {dimension_semantics = [#tpu.dimension_semantics<parallel>], iteration_bounds = array<i64: 1>, scalar_prefetch = 0 : i64, scratch_operands = 0 : i64, tpu.core_type = #tpu.core_type<tc>, window_params = [{transform_indices = @transform_0, window_bounds = array<i64: 16, 128>}, {pipeline_mode = #tpu.pipeline_mode<synchronous>, transform_indices = @transform_1, window_bounds = array<i64: 128, 128>}, {pipeline_mode = #tpu.pipeline_mode<synchronous>, transform_indices = @transform_2, window_bounds = array<i64: 1, 128>}, {pipeline_mode = #tpu.pipeline_mode<synchronous>, transform_indices = @transform_3, window_bounds = array<i64: 128, 128>}, {pipeline_mode = #tpu.pipeline_mode<synchronous>, transform_indices = @transform_4, window_bounds = array<i64: 1, 128>}, {pipeline_mode = #tpu.pipeline_mode<synchronous>, transform_indices = @transform_5, window_bounds = array<i64: 128, 128>}, {pipeline_mode = #tpu.pipeline_mode<synchronous>, transform_indices = @transform_6, window_bounds = array<i64: 1, 128>}, {transform_indices = @transform_7, window_bounds = array<i64: 16, 128>}]} {
    %c0 = arith.constant 0 : index
    %c0_0 = arith.constant 0 : index
    %0 = vector.load %arg1[%c0, %c0_0] : memref<16x128xbf16, #tpu.memory_space<vmem>>, vector<16x128xbf16>
    %c0_1 = arith.constant 0 : index
    %c0_2 = arith.constant 0 : index
    %1 = vector.load %arg2[%c0_1, %c0_2] : memref<128x128xbf16, #tpu.memory_space<vmem>>, vector<128x128xbf16>
    %c0_3 = arith.constant 0 : index
    %c0_4 = arith.constant 0 : index
    %2 = vector.load %arg3[%c0_3, %c0_4] : memref<1x128xf32, #tpu.memory_space<vmem>>, vector<1x128xf32>
    %cst = arith.constant dense<0.000000e+00> : vector<16x128xf32>
    %3 = tpu.matmul %0, %1, %cst {dimension_numbers = #tpu.dot_dimension_numbers<[1], [0], [0], [1], [0, 0, 1, 1], [], []>} : vector<16x128xbf16>, vector<128x128xbf16>, vector<16x128xf32> -> vector<16x128xf32>
    %4 = vector.broadcast %2 : vector<1x128xf32> to vector<16x128xf32>
    %5 = arith.addf %3, %4 : vector<16x128xf32>
    %cst_5 = arith.constant 0.000000e+00 : f32
    %6 = vector.broadcast %cst_5 : f32 to vector<16x128xf32>
    %7 = arith.maximumf %5, %6 : vector<16x128xf32>
    %8 = arith.truncf %7 : vector<16x128xf32> to vector<16x128xbf16>
    %c0_6 = arith.constant 0 : index
    %c0_7 = arith.constant 0 : index
    %9 = vector.load %arg4[%c0_6, %c0_7] : memref<128x128xbf16, #tpu.memory_space<vmem>>, vector<128x128xbf16>
    %c0_8 = arith.constant 0 : index
    %c0_9 = arith.constant 0 : index
    %10 = vector.load %arg5[%c0_8, %c0_9] : memref<1x128xf32, #tpu.memory_space<vmem>>, vector<1x128xf32>
    %cst_10 = arith.constant dense<0.000000e+00> : vector<16x128xf32>
    %11 = tpu.matmul %8, %9, %cst_10 {dimension_numbers = #tpu.dot_dimension_numbers<[1], [0], [0], [1], [0, 0, 1, 1], [], []>} : vector<16x128xbf16>, vector<128x128xbf16>, vector<16x128xf32> -> vector<16x128xf32>
    %12 = vector.broadcast %10 : vector<1x128xf32> to vector<16x128xf32>
    %13 = arith.addf %11, %12 : vector<16x128xf32>
    %cst_11 = arith.constant 0.000000e+00 : f32
    %14 = vector.broadcast %cst_11 : f32 to vector<16x128xf32>
    %15 = arith.maximumf %13, %14 : vector<16x128xf32>
    %16 = arith.truncf %15 : vector<16x128xf32> to vector<16x128xbf16>
    %c0_12 = arith.constant 0 : index
    %c0_13 = arith.constant 0 : index
    %17 = vector.load %arg6[%c0_12, %c0_13] : memref<128x128xbf16, #tpu.memory_space<vmem>>, vector<128x128xbf16>
    %c0_14 = arith.constant 0 : index
    %c0_15 = arith.constant 0 : index
    %18 = vector.load %arg7[%c0_14, %c0_15] : memref<1x128xf32, #tpu.memory_space<vmem>>, vector<1x128xf32>
    %cst_16 = arith.constant dense<0.000000e+00> : vector<16x128xf32>
    %19 = tpu.matmul %16, %17, %cst_16 {dimension_numbers = #tpu.dot_dimension_numbers<[1], [0], [0], [1], [0, 0, 1, 1], [], []>} : vector<16x128xbf16>, vector<128x128xbf16>, vector<16x128xf32> -> vector<16x128xf32>
    %20 = vector.broadcast %18 : vector<1x128xf32> to vector<16x128xf32>
    %21 = arith.addf %19, %20 : vector<16x128xf32>
    %22 = tpu.iota {dimensions = array<i32: 1>} : vector<16x128xi32>
    %c8_i32 = arith.constant 8 : i32
    %23 = vector.broadcast %c8_i32 : i32 to vector<16x128xi32>
    %24 = arith.cmpi slt, %22, %23 : vector<16x128xi32>
    %cst_17 = arith.constant -1.000000e+30 : f32
    %25 = vector.broadcast %cst_17 : f32 to vector<16x128xf32>
    %26 = arith.select %24, %21, %25 : vector<16x128xi1>, vector<16x128xf32>
    %cst_18 = arith.constant dense<0xFF800000> : vector<16xf32>
    %27 = vector.multi_reduction <maximumf>, %26, %cst_18 [1] : vector<16x128xf32> to vector<16xf32>
    %28 = vector.shape_cast %27 : vector<16xf32> to vector<16x1xf32>
    %29 = vector.broadcast %28 : vector<16x1xf32> to vector<16x128xf32>
    %30 = arith.subf %26, %29 : vector<16x128xf32>
    %31 = math.exp %30 : vector<16x128xf32>
    %cst_19 = arith.constant dense<0.000000e+00> : vector<16xf32>
    %32 = vector.multi_reduction <add>, %31, %cst_19 [1] : vector<16x128xf32> to vector<16xf32>
    %33 = vector.shape_cast %32 : vector<16xf32> to vector<16x1xf32>
    %34 = tpu.reciprocal %33 {approx = true} : vector<16x1xf32> -> vector<16x1xf32>
    %35 = vector.broadcast %34 : vector<16x1xf32> to vector<16x128xf32>
    %36 = arith.mulf %31, %35 : vector<16x128xf32>
    %c0_20 = arith.constant 0 : index
    %c0_21 = arith.constant 0 : index
    %37 = vector.load %arg8[%c0_20, %c0_21] : memref<16x128xf32, #tpu.memory_space<vmem>>, vector<16x128xf32>
    tpu.vector_store %arg8[%c0_20, %c0_21], %36 {strides = array<i32>} : memref<16x128xf32, #tpu.memory_space<vmem>>, vector<16x128xf32>,
    return
  }
  func.func @transform_0(%arg0: i32) -> (i32, i32) {
    %c0_i32 = arith.constant 0 : i32
    %c0_i32_0 = arith.constant 0 : i32
    return %arg0, %c0_i32 : i32, i32
  }
  func.func @transform_1(%arg0: i32) -> (i32, i32) {
    %c0_i32 = arith.constant 0 : i32
    %c0_i32_0 = arith.constant 0 : i32
    %c0_i32_1 = arith.constant 0 : i32
    return %c0_i32, %c0_i32_0 : i32, i32
  }
  func.func @transform_2(%arg0: i32) -> (i32, i32) {
    %c0_i32 = arith.constant 0 : i32
    %c0_i32_0 = arith.constant 0 : i32
    %c0_i32_1 = arith.constant 0 : i32
    return %c0_i32, %c0_i32_0 : i32, i32
  }
  func.func @transform_3(%arg0: i32) -> (i32, i32) {
    %c0_i32 = arith.constant 0 : i32
    %c0_i32_0 = arith.constant 0 : i32
    %c0_i32_1 = arith.constant 0 : i32
    return %c0_i32, %c0_i32_0 : i32, i32
  }
  func.func @transform_4(%arg0: i32) -> (i32, i32) {
    %c0_i32 = arith.constant 0 : i32
    %c0_i32_0 = arith.constant 0 : i32
    %c0_i32_1 = arith.constant 0 : i32
    return %c0_i32, %c0_i32_0 : i32, i32
  }
  func.func @transform_5(%arg0: i32) -> (i32, i32) {
    %c0_i32 = arith.constant 0 : i32
    %c0_i32_0 = arith.constant 0 : i32
    %c0_i32_1 = arith.constant 0 : i32
    return %c0_i32, %c0_i32_0 : i32, i32
  }
  func.func @transform_6(%arg0: i32) -> (i32, i32) {
    %c0_i32 = arith.constant 0 : i32
    %c0_i32_0 = arith.constant 0 : i32
    %c0_i32_1 = arith.constant 0 : i32
    return %c0_i32, %c0_i32_0 : i32, i32
  }
  func.func @transform_7(%arg0: i32) -> (i32, i32) {
    %c0_i32 = arith.constant 0 : i32
    %c0_i32_0 = arith.constant 0 : i32
    return %arg0, %c0_i32 : i32, i32
  }
}

module attributes {stable_mosaic.version = 11 : i64} {
  func.func @kernel(%arg0: i32, %arg1: memref<16x128xbf16, #tpu.memory_space<vmem>>, %arg2: memref<128x128xbf16, #tpu.memory_space<vmem>>, %arg3: memref<1x128xf32, #tpu.memory_space<vmem>>, %arg4: memref<128x128xbf16, #tpu.memory_space<vmem>>, %arg5: memref<1x128xf32, #tpu.memory_space<vmem>>, %arg6: memref<128x128xbf16, #tpu.memory_space<vmem>>, %arg7: memref<1x128xf32, #tpu.memory_space<vmem>>, %arg8: memref<16x128xf32, #tpu.memory_space<vmem>>) attributes {dimension_semantics = [#tpu.dimension_semantics<parallel>], iteration_bounds = array<i64: 1>, scalar_prefetch = 0 : i64, scratch_operands = 0 : i64, tpu.core_type = #tpu.core_type<tc>, window_params = [{transform_indices = @transform_0, window_bounds = array<i64: 16, 128>}, {pipeline_mode = #tpu.pipeline_mode<synchronous>, transform_indices = @transform_1, window_bounds = array<i64: 128, 128>}, {pipeline_mode = #tpu.pipeline_mode<synchronous>, transform_indices = @transform_2, window_bounds = array<i64: 1, 128>}, {pipeline_mode = #tpu.pipeline_mode<synchronous>, transform_indices = @transform_3, window_bounds = array<i64: 128, 128>}, {pipeline_mode = #tpu.pipeline_mode<synchronous>, transform_indices = @transform_4, window_bounds = array<i64: 1, 128>}, {pipeline_mode = #tpu.pipeline_mode<synchronous>, transform_indices = @transform_5, window_bounds = array<i64: 128, 128>}, {pipeline_mode = #tpu.pipeline_mode<synchronous>, transform_indices = @transform_6, window_bounds = array<i64: 1, 128>}, {transform_indices = @transform_7, window_bounds = array<i64: 16, 128>}]} {
    %c0 = arith.constant 0 : index
    %c0_0 = arith.constant 0 : index
    %0 = vector.load %arg1[%c0, %c0_0] : memref<16x128xbf16, #tpu.memory_space<vmem>>, vector<16x128xbf16>
    %c0_1 = arith.constant 0 : index
    %c0_2 = arith.constant 0 : index
    %1 = vector.load %arg2[%c0_1, %c0_2] : memref<128x128xbf16, #tpu.memory_space<vmem>>, vector<128x128xbf16>
    %c0_3 = arith.constant 0 : index
    %c0_4 = arith.constant 0 : index
    %2 = vector.load %arg3[%c0_3, %c0_4] : memref<1x128xf32, #tpu.memory_space<vmem>>, vector<1x128xf32>
    %cst = arith.constant dense<0.000000e+00> : vector<16x128xf32>
    %3 = tpu.matmul %0, %1, %cst {dimension_numbers = #tpu.dot_dimension_numbers<[1], [0], [0], [1], [0, 0, 1, 1], [], []>} : vector<16x128xbf16>, vector<128x128xbf16>, vector<16x128xf32> -> vector<16x128xf32>
    %4 = vector.broadcast %2 : vector<1x128xf32> to vector<16x128xf32>
    %5 = arith.addf %3, %4 : vector<16x128xf32>
    %cst_5 = arith.constant 0.000000e+00 : f32
    %6 = vector.broadcast %cst_5 : f32 to vector<16x128xf32>
    %7 = arith.maximumf %5, %6 : vector<16x128xf32>
    %8 = arith.truncf %7 : vector<16x128xf32> to vector<16x128xbf16>
    %c0_6 = arith.constant 0 : index
    %c0_7 = arith.constant 0 : index
    %9 = vector.load %arg4[%c0_6, %c0_7] : memref<128x128xbf16, #tpu.memory_space<vmem>>, vector<128x128xbf16>
    %c0_8 = arith.constant 0 : index
    %c0_9 = arith.constant 0 : index
    %10 = vector.load %arg5[%c0_8, %c0_9] : memref<1x128xf32, #tpu.memory_space<vmem>>, vector<1x128xf32>
    %cst_10 = arith.constant dense<0.000000e+00> : vector<16x128xf32>
    %11 = tpu.matmul %8, %9, %cst_10 {dimension_numbers = #tpu.dot_dimension_numbers<[1], [0], [0], [1], [0, 0, 1, 1], [], []>} : vector<16x128xbf16>, vector<128x128xbf16>, vector<16x128xf32> -> vector<16x128xf32>
    %12 = vector.broadcast %10 : vector<1x128xf32> to vector<16x128xf32>
    %13 = arith.addf %11, %12 : vector<16x128xf32>
    %cst_11 = arith.constant 0.000000e+00 : f32
    %14 = vector.broadcast %cst_11 : f32 to vector<16x128xf32>
    %15 = arith.maximumf %13, %14 : vector<16x128xf32>
    %16 = arith.truncf %15 : vector<16x128xf32> to vector<16x128xbf16>
    %c0_12 = arith.constant 0 : index
    %c0_13 = arith.constant 0 : index
    %17 = vector.load %arg6[%c0_12, %c0_13] : memref<128x128xbf16, #tpu.memory_space<vmem>>, vector<128x128xbf16>
    %c0_14 = arith.constant 0 : index
    %c0_15 = arith.constant 0 : index
    %18 = vector.load %arg7[%c0_14, %c0_15] : memref<1x128xf32, #tpu.memory_space<vmem>>, vector<1x128xf32>
    %cst_16 = arith.constant dense<0.000000e+00> : vector<16x128xf32>
    %19 = tpu.matmul %16, %17, %cst_16 {dimension_numbers = #tpu.dot_dimension_numbers<[1], [0], [0], [1], [0, 0, 1, 1], [], []>} : vector<16x128xbf16>, vector<128x128xbf16>, vector<16x128xf32> -> vector<16x128xf32>
    %20 = vector.broadcast %18 : vector<1x128xf32> to vector<16x128xf32>
    %21 = arith.addf %19, %20 : vector<16x128xf32>
    %22 = tpu.iota {dimensions = array<i32: 1>} : vector<16x128xi32>
    %c8_i32 = arith.constant 8 : i32
    %23 = vector.broadcast %c8_i32 : i32 to vector<16x128xi32>
    %24 = arith.cmpi slt, %22, %23 : vector<16x128xi32>
    %cst_17 = arith.constant -1.000000e+30 : f32
    %25 = vector.broadcast %cst_17 : f32 to vector<16x128xf32>
    %26 = arith.select %24, %21, %25 : vector<16x128xi1>, vector<16x128xf32>
    %cst_18 = arith.constant dense<0xFF800000> : vector<16xf32>
    %27 = vector.multi_reduction <maximumf>, %26, %cst_18 [1] : vector<16x128xf32> to vector<16xf32>
    %28 = vector.shape_cast %27 : vector<16xf32> to vector<16x1xf32>
    %29 = vector.broadcast %28 : vector<16x1xf32> to vector<16x128xf32>
    %30 = arith.subf %26, %29 : vector<16x128xf32>
    %31 = math.exp %30 : vector<16x128xf32>
    %cst_19 = arith.constant dense<0.000000e+00> : vector<16xf32>
    %32 = vector.multi_reduction <add>, %31, %cst_19 [1] : vector<16x128xf32> to vector<16xf32>
    %33 = vector.shape_cast %32 : vector<16xf32> to vector<16x1xf32>
    %34 = tpu.reciprocal %33 {approx = true} : vector<16x1xf32> -> vector<16x1xf32>
    %35 = vector.broadcast %34 : vector<16x1xf32> to vector<16x128xf32>
    %36 = arith.mulf %31, %35 : vector<16x128xf32>
    %c0_20 = arith.constant 0 : index
    %c0_21 = arith.constant 0 : index
    %37 = vector.load %arg8[%c0_20, %c0_21] : memref<16x128xf32, #tpu.memory_space<vmem>>, vector<16x128xf32>
    tpu.vector_store %arg8[%c0_20, %c0_21], %36 {strides = array<i32>} : memref<16x128xf32, #tpu.memory_space<vmem>>, vector<16x128xf32>,
    return
  }
  func.func @transform_0(%arg0: i32) -> (i32, i32) {
    %c0_i32 = arith.constant 0 : i32
    %c0_i32_0 = arith.constant 0 : i32
    return %arg0, %c0_i32 : i32, i32
  }
  func.func @transform_1(%arg0: i32) -> (i32, i32) {
    %c0_i32 = arith.constant 0 : i32
    %c0_i32_0 = arith.constant 0 : i32
    %c0_i32_1 = arith.constant 0 : i32
    return %c0_i32, %c0_i32_0 : i32, i32
  }
  func.func @transform_2(%arg0: i32) -> (i32, i32) {
    %c0_i32 = arith.constant 0 : i32
    %c0_i32_0 = arith.constant 0 : i32
    %c0_i32_1 = arith.constant 0 : i32
    return %c0_i32, %c0_i32_0 : i32, i32
  }
  func.func @transform_3(%arg0: i32) -> (i32, i32) {
    %c0_i32 = arith.constant 0 : i32
    %c0_i32_0 = arith.constant 0 : i32
    %c0_i32_1 = arith.constant 0 : i32
    return %c0_i32, %c0_i32_0 : i32, i32
  }
  func.func @transform_4(%arg0: i32) -> (i32, i32) {
    %c0_i32 = arith.constant 0 : i32
    %c0_i32_0 = arith.constant 0 : i32
    %c0_i32_1 = arith.constant 0 : i32
    return %c0_i32, %c0_i32_0 : i32, i32
  }
  func.func @transform_5(%arg0: i32) -> (i32, i32) {
    %c0_i32 = arith.constant 0 : i32
    %c0_i32_0 = arith.constant 0 : i32
    %c0_i32_1 = arith.constant 0 : i32
    return %c0_i32, %c0_i32_0 : i32, i32
  }
  func.func @transform_6(%arg0: i32) -> (i32, i32) {
    %c0_i32 = arith.constant 0 : i32
    %c0_i32_0 = arith.constant 0 : i32
    %c0_i32_1 = arith.constant 0 : i32
    return %c0_i32, %c0_i32_0 : i32, i32
  }
  func.func @transform_7(%arg0: i32) -> (i32, i32) {
    %c0_i32 = arith.constant 0 : i32
    %c0_i32_0 = arith.constant 0 : i32
    return %arg0, %c0_i32 : i32, i32
  }
}

</mosaic_0001>

<bundles_post_ra>
// kernel: tpu_custom_call.1
= control target key start
LH: loop header
LB: loop body
LE: loop exit
PB: predicated region body
PF: predicated region fallthrough
CT: control target
= control target key end

     0   :  { %12 = vsyncpa [#allocation3], 0  ;;  %s742_s0 = inlined_call_operand.hbm [shape: bf16[16,128], index: 0, kind: input, shape index: {}]   ;;  %s743_s1 = inlined_call_operand.hbm [shape: bf16[128,128], index: 1, kind: input, shape index: {}]   ;;  %s744_s2 = inlined_call_operand.vmem [shape: f32[1,128], index: 2, kind: input, shape index: {}]   ;;  %s745_s3 = inlined_call_operand.hbm [shape: bf16[128,128], index: 3, kind: input, shape index: {}]   ;;  %s746_s4 = inlined_call_operand.vmem [shape: f32[1,128], index: 4, kind: input, shape index: {}]   ;;  %s747_s5 = inlined_call_operand.hbm [shape: bf16[128,128], index: 5, kind: input, shape index: {}]   ;;  %s748_s6 = inlined_call_operand.vmem [shape: f32[1,128], index: 6, kind: input, shape index: {}]   ;;  %s749_s7 = inlined_call_operand.hbm [shape: f32[16,128], index: 7, kind: output, shape index: {}]  }
   0x1   :  { %13 = vsyncpa [#allocation6], 0 }
   0x2   :  { %14 = vsyncpa [#allocation9], 0 }
   0x3   :  { %15 = vsyncpa [#allocation4], 0  ;;  %s33_s26 = sshll.u32 %s743_s1, 4  ;;  %s669_s27 = smov [#allocation5]   ;;  %s34_s26 = int_to_ptr.hbm [resolvable:$true] %s33_s26 }
   0x4   :  { %s35_s28 = sshll.u32 %s669_s27, 4  ;;  %s20_s8 = sshll.u32 %s742_s0, 4  ;;  %s36_s28 = int_to_ptr.vmem [resolvable:$true] %s35_s28  ;;  %s21_s8 = int_to_ptr.hbm [resolvable:$true] %s20_s8 }
   0x5   :  { %s670_s9 = smov 64   ;;  %s671_s10 = smov 4  }
   0x6   :  { %41 = dma.hbm_to_vmem [thread:$0]  %s34_s26, 1024, %s36_s28, [#allocation6], %s670_s9, %s670_s9, %s671_s10  }
   0x7   :  { %s672_s11 = smov [#allocation2]   ;;  %s48_s15 = sshll.u32 %s745_s3, 4  ;;  %s49_s15 = int_to_ptr.hbm [resolvable:$true] %s48_s15 }
   0x8   :  { %s22_s12 = sshll.u32 %s672_s11, 4  ;;  %s63_s17 = sshll.u32 %s747_s5, 4  ;;  %s23_s12 = int_to_ptr.vmem [resolvable:$true] %s22_s12  ;;  %s64_s17 = int_to_ptr.hbm [resolvable:$true] %s63_s17 }
   0x9   :  { %28 = dma.hbm_to_vmem [thread:$0]  %s21_s8, 128, %s23_s12, [#allocation3], %s670_s9, %s670_s9, %s671_s10  }
   0xa   :  { %s673_s18 = smov [#allocation7]   ;;  %s674_s0 = smov [#allocation8]  }
   0xb   :  { %s50_s19 = sshll.u32 %s673_s18, 4  ;;  %s65_s20 = sshll.u32 %s674_s0, 4  ;;  %s51_s19 = int_to_ptr.vmem [resolvable:$true] %s50_s19  ;;  %s66_s20 = int_to_ptr.vmem [resolvable:$true] %s65_s20 }
   0xc   :  { %56 = dma.hbm_to_vmem [thread:$0]  %s49_s15, 1024, %s51_s19, [#allocation6], %s670_s9, %s670_s9, %s671_s10  }
   0xd   :  { %71 = dma.hbm_to_vmem [thread:$0]  %s64_s17, 1024, %s66_s20, [#allocation9], %s670_s9, %s670_s9, %s671_s10  }
   0xe   :  { %661 = dma.done.wait [#allocation3], 128  }
   0xf   :  { %662 = vsyncadd [#allocation3], 4294967168 }
  0x10   :  { %663 = dma.done.wait [#allocation6], 2048  }
  0x11   :  { %664 = vsyncadd [#allocation6], 4294965248 }
  0x12   :  { %665 = dma.done.wait [#allocation9], 1024  }
  0x13   :  { %666 = vsyncadd [#allocation9], 4294966272  ;;  %v504_v0 = vld [vmem:[#allocation5 + $0x38] sm:$0xff]  ;;  %v503_v1 = vld [vmem:[#allocation5 + $0x30] sm:$0xff]  ;;  %v350_v41 = vlaneseq  ;;  %s381_s26 = sshll.u32 %s749_s7, 4  ;;  %s676_s27 = smov 128   ;;  %s382_s26 = int_to_ptr.hbm [resolvable:$true] %s381_s26 }
  0x14   :  { %166 = vmatpush.bf16.msra.mxu0 %v504_v0  ;;  %v512_v2 = vld [vmem:[#allocation7 + $0x38] sm:$0xff]  ;;  %v511_v3 = vld [vmem:[#allocation7 + $0x30] sm:$0xff]  ;;  %v502_v4 = vld [vmem:[#allocation5 + $0x28] sm:$0xff]  ;;  %s677_s28 = smov 8  }
  0x15   :  { %251 = vmatpush.bf16.msra.mxu1 %v512_v2  ;;  %v510_v5 = vld [vmem:[#allocation7 + $0x28] sm:$0xff]  ;;  %v501_v6 = vld [vmem:[#allocation5 + $0x20] sm:$0xff]  ;;  %v500_v8 = vld [vmem:[#allocation5 + $0x18] sm:$0xff]  ;;  %v351_v42 = vand.u32 127, %v350_v41 }
  0x16   :  { %v509_v7 = vld [vmem:[#allocation7 + $0x20] sm:$0xff]  ;;  %v499_v9 = vld [vmem:[#allocation5 + $0x10] sm:$0xff]  ;;  %v498_v10 = vld [vmem:[#allocation5 + $0x8] sm:$0xff] }
  0x17   :  { %v497_v11 = vld [vmem:[#allocation5] sm:$0xff]  ;;  %v496_v12 = vld [vmem:[#allocation2] sm:$0xff]  ;;  %v507_v14 = vld [vmem:[#allocation7 + $0x10] sm:$0xff]  ;;  %vm352_vm0 = vcmp.lt.s32.totalorder %v351_v42, 8 }
  0x18   :  { %167 = vmatpush.bf16.msra.mxu0 %v503_v1  ;;  %v508_v13 = vld [vmem:[#allocation7 + $0x18] sm:$0xff]  ;;  %v506_v15 = vld [vmem:[#allocation7 + $0x8] sm:$0xff]  ;;  %v505_v16 = vld [vmem:[#allocation7] sm:$0xff] }
  0x19   :  { %252 = vmatpush.bf16.msra.mxu1 %v511_v3  ;;  %v520_v17 = vld [vmem:[#allocation8 + $0x38] sm:$0xff]  ;;  %v519_v18 = vld [vmem:[#allocation8 + $0x30] sm:$0xff]  ;;  %v518_v19 = vld [vmem:[#allocation8 + $0x28] sm:$0xff] }
  0x1a   :  { %336 = vmatpush.bf16.msra.mxu2 %v520_v17  ;;  %v517_v20 = vld [vmem:[#allocation8 + $0x20] sm:$0xff]  ;;  %v530_v22 = vld [vmem:[%s744_s2] ss:$0 sm:$0xff]  ;;  %v515_v30 = vld [vmem:[#allocation8 + $0x10] sm:$0xff] }
  0x1b   :  { %v516_v29 = vld [vmem:[#allocation8 + $0x18] sm:$0xff]  ;;  %v514_v31 = vld [vmem:[#allocation8 + $0x8] sm:$0xff]  ;;  %v513_v32 = vld [vmem:[#allocation8] sm:$0xff] }
  0x1c   :  { %168 = vmatpush.bf16.msra.mxu0 %v502_v4  ;;  %v531_v34 = vld [vmem:[%s746_s4] ss:$0 sm:$0xff]  ;;  %s675_s4 = smov [#allocation10]  }
  0x1d   :  { %253 = vmatpush.bf16.msra.mxu1 %v510_v5  ;;  %v532_v43 = vld [vmem:[%s748_s6] ss:$0 sm:$0xff]  ;;  %s379_s6 = sshll.u32 %s675_s4, 4  ;;  %s380_s6 = int_to_ptr.vmem [resolvable:$true] %s379_s6 }
  0x1e   :  { %337 = vmatpush.bf16.msra.mxu2 %v519_v18 }
  0x20   :  { %169 = vmatpush.bf16.msra.mxu0 %v501_v6 }
  0x21   :  { %254 = vmatpush.bf16.msra.mxu1 %v509_v7 }
  0x22   :  { %338 = vmatpush.bf16.msra.mxu2 %v518_v19 }
  0x24   :  { %170 = vmatpush.bf16.msra.mxu0 %v500_v8 }
  0x25   :  { %255 = vmatpush.bf16.msra.mxu1 %v508_v13 }
  0x26   :  { %339 = vmatpush.bf16.msra.mxu2 %v517_v20 }
  0x28   :  { %171 = vmatpush.bf16.msra.mxu0 %v499_v9 }
  0x29   :  { %256 = vmatpush.bf16.msra.mxu1 %v507_v14 }
  0x2a   :  { %340 = vmatpush.bf16.msra.mxu2 %v516_v29 }
  0x2c   :  { %172 = vmatpush.bf16.msra.mxu0 %v498_v10 }
  0x2d   :  { %257 = vmatpush.bf16.msra.mxu1 %v506_v15 }
  0x2e   :  { %341 = vmatpush.bf16.msra.mxu2 %v515_v30 }
  0x30   :  { %173 = vmatpush.bf16.msra.mxu0 %v497_v11 }
  0x31   :  { %258 = vmatpush.bf16.msra.mxu1 %v505_v16 }
  0x32   :  { %342 = vmatpush.bf16.msra.mxu2 %v514_v31 }
  0x33   :  { %174 = vmatmul.bf16.vlgmr.msra.gmra.mxu0 %v496_v12 }
  0x36   :  { %343 = vmatpush.bf16.msra.mxu2 %v513_v32 }
  0xb0   :  { %v175_v21 = vpop.f32.mrf.mxu0 }
  0xb1   :  { %v176_v23 = vadd.f32 %v530_v22, %v175_v21 }
  0xb3   :  { %v180_v26 = vmax.f32 %v176_v23, 0.0 }
  0xb8   :  { %v177_v24 = vpop.f32.mrf.mxu0 }
  0xb9   :  { %v178_v25 = vadd.f32 %v530_v22, %v177_v24 }
  0xbb   :  { %v181_v27 = vmax.f32 %v178_v25, 0.0 }
  0xbd   :  { %v182_v28 = vpack.c.bf16 %v181_v27, %v180_v26 }
  0xbf   :  { %259 = vmatmul.bf16.vlgmr.msra.gmra.mxu1 %v182_v28 }
 0x13c   :  { %v260_v33 = vpop.f32.mrf.mxu1 }
 0x13d   :  { %v261_v35 = vadd.f32 %v531_v34, %v260_v33 }
 0x13f   :  { %v265_v38 = vmax.f32 %v261_v35, 0.0 }
 0x144   :  { %v262_v36 = vpop.f32.mrf.mxu1 }
 0x145   :  { %v263_v37 = vadd.f32 %v531_v34, %v262_v36 }
 0x147   :  { %v266_v39 = vmax.f32 %v263_v37, 0.0 }
 0x149   :  { %v267_v40 = vpack.c.bf16 %v266_v39, %v265_v38 }
 0x14b   :  { %344 = vmatmul.bf16.vlgmr.msra.gmra.mxu2 %v267_v40 }
 0x1ce   :  { %v345_v44 = vpop.f32.mrf.mxu2 }
 0x1cf   :  { %v346_v45 = vadd.f32 %v532_v43, %v345_v44 }
 0x1d1   :  { %v353_v46 = vsel %vm352_vm0, %v346_v45, -1e+30 }
 0x1d2   :  { %355 = vmax.xlane.f32.xlu0 %v353_v46 }
 0x1d6   :  { %v347_v47 = vpop.f32.mrf.mxu2 }
 0x1d7   :  { %v348_v48 = vadd.f32 %v532_v43, %v347_v47 }
 0x1d9   :  { %v354_v49 = vsel %vm352_vm0, %v348_v48, -1e+30 }
 0x1da   :  { %357 = vmax.xlane.f32.xlu0 %v354_v49 }
 0x245   :  { %v356_v50 = vpop.xlane.xlu0 %355 }
 0x246   :  { %v359_v51 = vsub.f32 %v353_v46, %v356_v50 }
 0x248   :  { %v361_v52 = vmul.f32 1.442695, %v359_v51 }
 0x24a   :  { %533 = vpow2.f32 %v361_v52 }
 0x24d   :  { %v358_v53 = vpop.xlane.xlu0 %357 }
 0x24e   :  { %v360_v54 = vsub.f32 %v354_v49, %v358_v53 }
 0x250   :  { %v534_v55 = vpop.eup %533  ;;  %v363_v56 = vmul.f32 1.442695, %v360_v54 }
 0x251   :  { %365 = vadd.xlane.f32.xlu1 %v534_v55 }
 0x252   :  { %535 = vpow2.f32 %v363_v56 }
 0x258   :  { %v536_v57 = vpop.eup %535 }
 0x259   :  { %367 = vadd.xlane.f32.xlu1 %v536_v57 }
 0x2c4   :  { %v366_v58 = vpop.xlane.xlu1 %365 }
 0x2c5   :  { %537 = vrcp.f32 %v366_v58 }
 0x2cb   :  { %v538_v59 = vpop.eup %537 }
 0x2cc   :  { %v371_v60 = vmul.f32 %v538_v59, %v534_v55  ;;  %v368_v61 = vpop.xlane.xlu1 %367 }
 0x2cd   :  { %539 = vrcp.f32 %v368_v61 }
 0x2ce   :  { %373 = vst [vmem:[#allocation10] sm:$0xff] %v371_v60 }
 0x2d3   :  { %v540_v62 = vpop.eup %539 }
 0x2d4   :  { %v372_v63 = vmul.f32 %v540_v62, %v536_v57 }
 0x2d6   :  { %374 = vst [vmem:[#allocation10 + $0x8] sm:$0xff] %v372_v63 }
 0x2d7   :  { %387 = dma.vmem_to_hbm [thread:$0]  %s380_s6, 256, %s382_s26, [#allocation4], %s676_s27, %s676_s27, %s677_s28  }
 0x2d8   :  { %667 = dma.done.wait [#allocation4], 256  }
 0x2d9   :  { %668 = vsyncadd [#allocation4], 4294967040 }
 0x2da   :  { %392 = vsyncpa [#allocation3], 1 }
 0x2db   :  { %393 = vsyncpa [#allocation6], 1 }
 0x2dc   :  { %394 = vsyncpa [#allocation9], 1 }
 0x2dd   :  { %395 = vsyncpa [#allocation4], 1 }

// kernel: tpu_custom_call.1
= control target key start
LH: loop header
LB: loop body
LE: loop exit
PB: predicated region body
PF: predicated region fallthrough
CT: control target
= control target key end

     0   :  { %12 = vsyncpa [#allocation3], 0  ;;  %s742_s0 = inlined_call_operand.hbm [shape: bf16[16,128], index: 0, kind: input, shape index: {}]   ;;  %s743_s1 = inlined_call_operand.hbm [shape: bf16[128,128], index: 1, kind: input, shape index: {}]   ;;  %s744_s2 = inlined_call_operand.vmem [shape: f32[1,128], index: 2, kind: input, shape index: {}]   ;;  %s745_s3 = inlined_call_operand.hbm [shape: bf16[128,128], index: 3, kind: input, shape index: {}]   ;;  %s746_s4 = inlined_call_operand.vmem [shape: f32[1,128], index: 4, kind: input, shape index: {}]   ;;  %s747_s5 = inlined_call_operand.hbm [shape: bf16[128,128], index: 5, kind: input, shape index: {}]   ;;  %s748_s6 = inlined_call_operand.vmem [shape: f32[1,128], index: 6, kind: input, shape index: {}]   ;;  %s749_s7 = inlined_call_operand.hbm [shape: f32[16,128], index: 7, kind: output, shape index: {}]  }
   0x1   :  { %13 = vsyncpa [#allocation6], 0 }
   0x2   :  { %14 = vsyncpa [#allocation9], 0 }
   0x3   :  { %15 = vsyncpa [#allocation4], 0  ;;  %s33_s26 = sshll.u32 %s743_s1, 4  ;;  %s669_s27 = smov [#allocation5]   ;;  %s34_s26 = int_to_ptr.hbm [resolvable:$true] %s33_s26 }
   0x4   :  { %s35_s28 = sshll.u32 %s669_s27, 4  ;;  %s20_s8 = sshll.u32 %s742_s0, 4  ;;  %s36_s28 = int_to_ptr.vmem [resolvable:$true] %s35_s28  ;;  %s21_s8 = int_to_ptr.hbm [resolvable:$true] %s20_s8 }
   0x5   :  { %s670_s9 = smov 64   ;;  %s671_s10 = smov 4  }
   0x6   :  { %41 = dma.hbm_to_vmem [thread:$0]  %s34_s26, 1024, %s36_s28, [#allocation6], %s670_s9, %s670_s9, %s671_s10  }
   0x7   :  { %s672_s11 = smov [#allocation2]   ;;  %s48_s15 = sshll.u32 %s745_s3, 4  ;;  %s49_s15 = int_to_ptr.hbm [resolvable:$true] %s48_s15 }
   0x8   :  { %s22_s12 = sshll.u32 %s672_s11, 4  ;;  %s63_s17 = sshll.u32 %s747_s5, 4  ;;  %s23_s12 = int_to_ptr.vmem [resolvable:$true] %s22_s12  ;;  %s64_s17 = int_to_ptr.hbm [resolvable:$true] %s63_s17 }
   0x9   :  { %28 = dma.hbm_to_vmem [thread:$0]  %s21_s8, 128, %s23_s12, [#allocation3], %s670_s9, %s670_s9, %s671_s10  }
   0xa   :  { %s673_s18 = smov [#allocation7]   ;;  %s674_s0 = smov [#allocation8]  }
   0xb   :  { %s50_s19 = sshll.u32 %s673_s18, 4  ;;  %s65_s20 = sshll.u32 %s674_s0, 4  ;;  %s51_s19 = int_to_ptr.vmem [resolvable:$true] %s50_s19  ;;  %s66_s20 = int_to_ptr.vmem [resolvable:$true] %s65_s20 }
   0xc   :  { %56 = dma.hbm_to_vmem [thread:$0]  %s49_s15, 1024, %s51_s19, [#allocation6], %s670_s9, %s670_s9, %s671_s10  }
   0xd   :  { %71 = dma.hbm_to_vmem [thread:$0]  %s64_s17, 1024, %s66_s20, [#allocation9], %s670_s9, %s670_s9, %s671_s10  }
   0xe   :  { %661 = dma.done.wait [#allocation3], 128  }
   0xf   :  { %662 = vsyncadd [#allocation3], 4294967168 }
  0x10   :  { %663 = dma.done.wait [#allocation6], 2048  }
  0x11   :  { %664 = vsyncadd [#allocation6], 4294965248 }
  0x12   :  { %665 = dma.done.wait [#allocation9], 1024  }
  0x13   :  { %666 = vsyncadd [#allocation9], 4294966272  ;;  %v504_v0 = vld [vmem:[#allocation5 + $0x38] sm:$0xff]  ;;  %v503_v1 = vld [vmem:[#allocation5 + $0x30] sm:$0xff]  ;;  %v350_v41 = vlaneseq  ;;  %s381_s26 = sshll.u32 %s749_s7, 4  ;;  %s676_s27 = smov 128   ;;  %s382_s26 = int_to_ptr.hbm [resolvable:$true] %s381_s26 }
  0x14   :  { %166 = vmatpush.bf16.msra.mxu0 %v504_v0  ;;  %v512_v2 = vld [vmem:[#allocation7 + $0x38] sm:$0xff]  ;;  %v511_v3 = vld [vmem:[#allocation7 + $0x30] sm:$0xff]  ;;  %v502_v4 = vld [vmem:[#allocation5 + $0x28] sm:$0xff]  ;;  %s677_s28 = smov 8  }
  0x15   :  { %251 = vmatpush.bf16.msra.mxu1 %v512_v2  ;;  %v510_v5 = vld [vmem:[#allocation7 + $0x28] sm:$0xff]  ;;  %v501_v6 = vld [vmem:[#allocation5 + $0x20] sm:$0xff]  ;;  %v500_v8 = vld [vmem:[#allocation5 + $0x18] sm:$0xff]  ;;  %v351_v42 = vand.u32 127, %v350_v41 }
  0x16   :  { %v509_v7 = vld [vmem:[#allocation7 + $0x20] sm:$0xff]  ;;  %v499_v9 = vld [vmem:[#allocation5 + $0x10] sm:$0xff]  ;;  %v498_v10 = vld [vmem:[#allocation5 + $0x8] sm:$0xff] }
  0x17   :  { %v497_v11 = vld [vmem:[#allocation5] sm:$0xff]  ;;  %v496_v12 = vld [vmem:[#allocation2] sm:$0xff]  ;;  %v507_v14 = vld [vmem:[#allocation7 + $0x10] sm:$0xff]  ;;  %vm352_vm0 = vcmp.lt.s32.totalorder %v351_v42, 8 }
  0x18   :  { %167 = vmatpush.bf16.msra.mxu0 %v503_v1  ;;  %v508_v13 = vld [vmem:[#allocation7 + $0x18] sm:$0xff]  ;;  %v506_v15 = vld [vmem:[#allocation7 + $0x8] sm:$0xff]  ;;  %v505_v16 = vld [vmem:[#allocation7] sm:$0xff] }
  0x19   :  { %252 = vmatpush.bf16.msra.mxu1 %v511_v3  ;;  %v520_v17 = vld [vmem:[#allocation8 + $0x38] sm:$0xff]  ;;  %v519_v18 = vld [vmem:[#allocation8 + $0x30] sm:$0xff]  ;;  %v518_v19 = vld [vmem:[#allocation8 + $0x28] sm:$0xff] }
  0x1a   :  { %336 = vmatpush.bf16.msra.mxu2 %v520_v17  ;;  %v517_v20 = vld [vmem:[#allocation8 + $0x20] sm:$0xff]  ;;  %v530_v22 = vld [vmem:[%s744_s2] ss:$0 sm:$0xff]  ;;  %v515_v30 = vld [vmem:[#allocation8 + $0x10] sm:$0xff] }
  0x1b   :  { %v516_v29 = vld [vmem:[#allocation8 + $0x18] sm:$0xff]  ;;  %v514_v31 = vld [vmem:[#allocation8 + $0x8] sm:$0xff]  ;;  %v513_v32 = vld [vmem:[#allocation8] sm:$0xff] }
  0x1c   :  { %168 = vmatpush.bf16.msra.mxu0 %v502_v4  ;;  %v531_v34 = vld [vmem:[%s746_s4] ss:$0 sm:$0xff]  ;;  %s675_s4 = smov [#allocation10]  }
  0x1d   :  { %253 = vmatpush.bf16.msra.mxu1 %v510_v5  ;;  %v532_v43 = vld [vmem:[%s748_s6] ss:$0 sm:$0xff]  ;;  %s379_s6 = sshll.u32 %s675_s4, 4  ;;  %s380_s6 = int_to_ptr.vmem [resolvable:$true] %s379_s6 }
  0x1e   :  { %337 = vmatpush.bf16.msra.mxu2 %v519_v18 }
  0x20   :  { %169 = vmatpush.bf16.msra.mxu0 %v501_v6 }
  0x21   :  { %254 = vmatpush.bf16.msra.mxu1 %v509_v7 }
  0x22   :  { %338 = vmatpush.bf16.msra.mxu2 %v518_v19 }
  0x24   :  { %170 = vmatpush.bf16.msra.mxu0 %v500_v8 }
  0x25   :  { %255 = vmatpush.bf16.msra.mxu1 %v508_v13 }
  0x26   :  { %339 = vmatpush.bf16.msra.mxu2 %v517_v20 }
  0x28   :  { %171 = vmatpush.bf16.msra.mxu0 %v499_v9 }
  0x29   :  { %256 = vmatpush.bf16.msra.mxu1 %v507_v14 }
  0x2a   :  { %340 = vmatpush.bf16.msra.mxu2 %v516_v29 }
  0x2c   :  { %172 = vmatpush.bf16.msra.mxu0 %v498_v10 }
  0x2d   :  { %257 = vmatpush.bf16.msra.mxu1 %v506_v15 }
  0x2e   :  { %341 = vmatpush.bf16.msra.mxu2 %v515_v30 }
  0x30   :  { %173 = vmatpush.bf16.msra.mxu0 %v497_v11 }
  0x31   :  { %258 = vmatpush.bf16.msra.mxu1 %v505_v16 }
  0x32   :  { %342 = vmatpush.bf16.msra.mxu2 %v514_v31 }
  0x33   :  { %174 = vmatmul.bf16.vlgmr.msra.gmra.mxu0 %v496_v12 }
  0x36   :  { %343 = vmatpush.bf16.msra.mxu2 %v513_v32 }
  0xb0   :  { %v175_v21 = vpop.f32.mrf.mxu0 }
  0xb1   :  { %v176_v23 = vadd.f32 %v530_v22, %v175_v21 }
  0xb3   :  { %v180_v26 = vmax.f32 %v176_v23, 0.0 }
  0xb8   :  { %v177_v24 = vpop.f32.mrf.mxu0 }
  0xb9   :  { %v178_v25 = vadd.f32 %v530_v22, %v177_v24 }
  0xbb   :  { %v181_v27 = vmax.f32 %v178_v25, 0.0 }
  0xbd   :  { %v182_v28 = vpack.c.bf16 %v181_v27, %v180_v26 }
  0xbf   :  { %259 = vmatmul.bf16.vlgmr.msra.gmra.mxu1 %v182_v28 }
 0x13c   :  { %v260_v33 = vpop.f32.mrf.mxu1 }
 0x13d   :  { %v261_v35 = vadd.f32 %v531_v34, %v260_v33 }
 0x13f   :  { %v265_v38 = vmax.f32 %v261_v35, 0.0 }
 0x144   :  { %v262_v36 = vpop.f32.mrf.mxu1 }
 0x145   :  { %v263_v37 = vadd.f32 %v531_v34, %v262_v36 }
 0x147   :  { %v266_v39 = vmax.f32 %v263_v37, 0.0 }
 0x149   :  { %v267_v40 = vpack.c.bf16 %v266_v39, %v265_v38 }
 0x14b   :  { %344 = vmatmul.bf16.vlgmr.msra.gmra.mxu2 %v267_v40 }
 0x1ce   :  { %v345_v44 = vpop.f32.mrf.mxu2 }
 0x1cf   :  { %v346_v45 = vadd.f32 %v532_v43, %v345_v44 }
 0x1d1   :  { %v353_v46 = vsel %vm352_vm0, %v346_v45, -1e+30 }
 0x1d2   :  { %355 = vmax.xlane.f32.xlu0 %v353_v46 }
 0x1d6   :  { %v347_v47 = vpop.f32.mrf.mxu2 }
 0x1d7   :  { %v348_v48 = vadd.f32 %v532_v43, %v347_v47 }
 0x1d9   :  { %v354_v49 = vsel %vm352_vm0, %v348_v48, -1e+30 }
 0x1da   :  { %357 = vmax.xlane.f32.xlu0 %v354_v49 }
 0x245   :  { %v356_v50 = vpop.xlane.xlu0 %355 }
 0x246   :  { %v359_v51 = vsub.f32 %v353_v46, %v356_v50 }
 0x248   :  { %v361_v52 = vmul.f32 1.442695, %v359_v51 }
 0x24a   :  { %533 = vpow2.f32 %v361_v52 }
 0x24d   :  { %v358_v53 = vpop.xlane.xlu0 %357 }
 0x24e   :  { %v360_v54 = vsub.f32 %v354_v49, %v358_v53 }
 0x250   :  { %v534_v55 = vpop.eup %533  ;;  %v363_v56 = vmul.f32 1.442695, %v360_v54 }
 0x251   :  { %365 = vadd.xlane.f32.xlu1 %v534_v55 }
 0x252   :  { %535 = vpow2.f32 %v363_v56 }
 0x258   :  { %v536_v57 = vpop.eup %535 }
 0x259   :  { %367 = vadd.xlane.f32.xlu1 %v536_v57 }
 0x2c4   :  { %v366_v58 = vpop.xlane.xlu1 %365 }
 0x2c5   :  { %537 = vrcp.f32 %v366_v58 }
 0x2cb   :  { %v538_v59 = vpop.eup %537 }
 0x2cc   :  { %v371_v60 = vmul.f32 %v538_v59, %v534_v55  ;;  %v368_v61 = vpop.xlane.xlu1 %367 }
 0x2cd   :  { %539 = vrcp.f32 %v368_v61 }
 0x2ce   :  { %373 = vst [vmem:[#allocation10] sm:$0xff] %v371_v60 }
 0x2d3   :  { %v540_v62 = vpop.eup %539 }
 0x2d4   :  { %v372_v63 = vmul.f32 %v540_v62, %v536_v57 }
 0x2d6   :  { %374 = vst [vmem:[#allocation10 + $0x8] sm:$0xff] %v372_v63 }
 0x2d7   :  { %387 = dma.vmem_to_hbm [thread:$0]  %s380_s6, 256, %s382_s26, [#allocation4], %s676_s27, %s676_s27, %s677_s28  }
 0x2d8   :  { %667 = dma.done.wait [#allocation4], 256  }
 0x2d9   :  { %668 = vsyncadd [#allocation4], 4294967040 }
 0x2da   :  { %392 = vsyncpa [#allocation3], 1 }
 0x2db   :  { %393 = vsyncpa [#allocation6], 1 }
 0x2dc   :  { %394 = vsyncpa [#allocation9], 1 }
 0x2dd   :  { %395 = vsyncpa [#allocation4], 1 }

</bundles_post_ra>
